<compile_context>
chip_gen: v7x
topology: tpu7x:2x2x1
jax: 0.10.0
libtpu: 0.0.40
codegen_flags: <defaults>
</compile_context>

<pallas_src>
import math

import jax
import jax.numpy as jnp
from jax.experimental import pallas as pl
from jax.experimental.pallas import tpu as pltpu

LANES = 128
_TEMP_TILES = 6          # full-size f32 temporaries assumed live by the VMEM budget
_VREG_COL_BYTES = 32     # bytes per lane-column of one native 32-bit VMEM tile (8 x 4B)


# ----------------------------------------------------------------------------
# VMEM sizing helpers (honest footprint model, generation-aware budget).
# ----------------------------------------------------------------------------
def _padded_col_bytes(rows, itemsize):
    """VMEM bytes one lane-column of a (rows, hw) block really occupies,
    including sublane padding to the native (8/16/32, 128) tile of the dtype."""
    sub = max(1, _VREG_COL_BYTES // itemsize)        # 8 for f32, 16 bf16, 32 int8
    return -(-rows // sub) * sub * itemsize


def _vmem_capacity_bytes():
    try:
        cap = getattr(pltpu.get_tpu_info(), "vmem_capacity_bytes", None)
        if cap:
            return int(cap)
    except Exception:
        pass
    return 64 << 20      # conservative default == v7x per-TensorCore VMEM


def _vmem_plan():
    """(vmem_limit_bytes, per-step footprint budget), per TPU generation.

    v5e/v6e (128 MiB physical): raise the scoped limit to ~100 MiB, ~33 MiB/step
      so the big pipeline steps amortize the ~0.35 us per-step overhead.
    v7x (64 MiB physical): limit 48 MiB, ~16 MiB/step (~4-6 MiB of raw inputs).
    """
    cap = _vmem_capacity_bytes()
    vmem_limit = max(min(cap - (16 << 20), 100 << 20), 24 << 20)
    return vmem_limit, vmem_limit // 3


def _choose_hw_block(hw, block_rows_itemsize, c, budget_bytes):
    """Largest lane-aligned spatial block whose honest per-step footprint
    (double-buffered sublane-padded inputs + f32 temporaries) fits the budget.
    Prefers exact divisors of `hw` so no zero-padding is required."""
    per_col_in = sum(_padded_col_bytes(r, s) for r, s in block_rows_itemsize)
    per_col = 2 * per_col_in + _TEMP_TILES * _padded_col_bytes(c, 4)
    hw_cap = -(-hw // LANES) * LANES
    max_blk = (budget_bytes // per_col) // LANES * LANES
    max_blk = min(max(max_blk, LANES), hw_cap)
    if hw % LANES == 0:
        divs = [d * LANES for d in range(1, hw // LANES + 1)
                if hw % (d * LANES) == 0 and d * LANES <= max_blk]
        if divs:
            return max(divs)
    return max_blk


# ----------------------------------------------------------------------------
# Fused reduction kernel.
# ----------------------------------------------------------------------------
def _make_fused_kernel(n_mod, c, cm):
    """Inputs per grid step (b, g, j):
         vol_m : (1, c, hw_blk)   m in range(n_mod)   (native dtype)
         label : (1, c, hw_blk)
         mask  : (1, cm, hw_blk)  cm in {1, c}        (never broadcast to C)
       Output (resident accumulator across the innermost j axis):
         acc   : (1, 1, 3*n_mod + 1, 1) f32
                 layout: [single_sq(m)..., mvc_sq(m)..., cons_sq(m)..., mask_cnt]
    """
    inv_m = 1.0 / n_mod

    def _reduce_all(x):
        # (rows, hw_blk) -> (1, 1): lane reduce (VALU vreg adds + one in-vreg XLU
        # fold) then a tiny sublane fold.  No reshapes -> no retiling copies.
        t = jnp.sum(x, axis=-1, keepdims=True)            # (rows, 1)
        return jnp.sum(t, axis=0, keepdims=True)          # (1, 1)

    def kernel(*refs):
        vol_refs = refs[:n_mod]
        label_ref = refs[n_mod]
        mask_ref = refs[n_mod + 1]
        acc_ref = refs[n_mod + 2]

        @pl.when(pl.program_id(2) == 0)
        def _init():
            acc_ref[...] = jnp.zeros_like(acc_ref)

        lab = label_ref[0].astype(jnp.float32)             # (c, hw_blk)
        msk = mask_ref[0].astype(jnp.float32)              # (cm, hw_blk)

        def _masked_reduce(e):
            # sum(e * broadcast(mask)) WITHOUT materializing the broadcast:
            # fold channels first (mask is channel-invariant), multiply by the
            # single mask row once, then lane-reduce.
            if cm == 1:
                s = jnp.sum(e, axis=0, keepdims=True)      # (1, hw_blk)
                return jnp.sum(s * msk, axis=-1, keepdims=True)   # (1, 1)
            return _reduce_all(e * msk)                    # per-channel mask

        # Pass 1: ensemble mean ("tgt_map"), in-register only.
        tgt = vol_refs[0][0].astype(jnp.float32)
        for m in range(1, n_mod):
            tgt = tgt + vol_refs[m][0].astype(jnp.float32)
        tgt = tgt * jnp.float32(inv_m)

        # Pass 2: per-modality terms; each diff is consumed immediately so only
        # O(1) full-tile temporaries are live besides lab / tgt / msk.
        p_single, p_mvc, p_cons = [], [], []
        for m in range(n_mod):
            v = vol_refs[m][0].astype(jnp.float32)
            d = v - lab
            p_single.append(_masked_reduce(d * d))         # masked MSE vs. label
            d = v - tgt
            e = d * d
            p_mvc.append(_masked_reduce(e))                # masked MSE vs. tgt_map
            p_cons.append(_reduce_all(e))                  # unmasked consistency

        if cm == 1:
            p_cnt = jnp.sum(msk, axis=-1, keepdims=True)   # (1,1); x C in epilogue
        else:
            p_cnt = _reduce_all(msk)

        # One stacked accumulator update (single read-modify-write).
        upd = jnp.concatenate(p_single + p_mvc + p_cons + [p_cnt], axis=0)
        acc_ref[...] = acc_ref[...] + upd[None, None]

    return kernel


def fused_bundled_reductions(vols, label, mask):
    """One fused Pallas pass over all volumes.

    vols  : list of M arrays [B, C, H, W]   (any float dtype; cast in-kernel)
    label : [B, C, H, W]
    mask  : [B, Cm, H, W] with Cm in {1, C} (kept un-broadcast)

    Returns per-modality (M,) arrays: single_mse, mvc_mse, cons_mse.
    """
    n_mod = len(vols)
    B, C, H, W = vols[0].shape
    HW = H * W
    Cm = mask.shape[1]
    assert Cm in (1, C), "mask channel dim must be 1 or C"

    vmem_limit, budget = _vmem_plan()
    rows_itemsize = ([(C, vols[m].dtype.itemsize) for m in range(n_mod)]
                     + [(C, label.dtype.itemsize), (Cm, mask.dtype.itemsize)])
    hw_blk = _choose_hw_block(HW, rows_itemsize, C, budget)

    n_tiles = pl.cdiv(HW, hw_blk)
    # Spatial "super-chunk" axis: keeps both v7x TensorCores busy when B is 1/odd.
    G = 2 if (B % 2 == 1 and n_tiles >= 2) else 1
    J = pl.cdiv(n_tiles, G)
    HW_pad = G * J * hw_blk

    def _prep(x):
        x = x.reshape(B, x.shape[1], HW)
        if HW_pad != HW:
            # Zero padding is exact: padded positions contribute 0 to every term.
            x = jnp.pad(x, ((0, 0), (0, 0), (0, HW_pad - HW)))
        return x

    v2 = [_prep(v) for v in vols]
    l2 = _prep(label)
    m2 = _prep(mask)

    nacc = 3 * n_mod + 1
    vol_spec = pl.BlockSpec((1, C, hw_blk), lambda b, g, j: (b, 0, g * J + j))
    in_specs = [vol_spec] * n_mod + [
        pl.BlockSpec((1, C, hw_blk), lambda b, g, j: (b, 0, g * J + j)),   # label
        pl.BlockSpec((1, Cm, hw_blk), lambda b, g, j: (b, 0, g * J + j)),  # mask
    ]
    out_spec = pl.BlockSpec((1, 1, nacc, 1), lambda b, g, j: (b, g, 0, 0))

    acc = pl.pallas_call(
        _make_fused_kernel(n_mod, C, Cm),
        out_shape=jax.ShapeDtypeStruct((B, G, nacc, 1), jnp.float32),
        grid_spec=pltpu.PrefetchScalarGridSpec(
            num_scalar_prefetch=0,
            grid=(B, G, J),
            in_specs=in_specs,
            out_specs=out_spec,
        ),
        compiler_params=pltpu.CompilerParams(
            dimension_semantics=("parallel", "parallel", "arbitrary"),
            vmem_limit_bytes=vmem_limit),
    )(*v2, l2, m2)

    # Tiny epilogue in plain JAX: fold the per-(batch, super-chunk) partials.
    sums = jnp.sum(acc, axis=(0, 1, 3))                    # (nacc,)
    single_sq = sums[:n_mod]
    mvc_sq = sums[n_mod:2 * n_mod]
    cons_sq = sums[2 * n_mod:3 * n_mod]
    # The kernel counts mask positions (not broadcast elements) when Cm == 1.
    mask_cnt = sums[3 * n_mod] * (jnp.float32(C) if Cm == 1 else jnp.float32(1.0))

    denom = jnp.maximum(mask_cnt, 1.0)
    n_elems = jnp.float32(B * C * HW)                      # true (unpadded) count
    return {
        "single_mse": single_sq / denom,
        "mvc_mse": mvc_sq / denom,
        "cons_mse": cons_sq / n_elems,
    }


# ----------------------------------------------------------------------------
# BundledLoss forward (plain-Python glue reproducing the PyTorch control flow,
# with the three synthetic sub-losses fused into the single Pallas pass above).
# ----------------------------------------------------------------------------
class BundledLoss:
    def __init__(self, multi_view_consistency_weight, mvc_time_dependent,
                 mvc_steepness, modality, consistency_weight, consistency_source):
        self.mvc_weight = multi_view_consistency_weight
        self.mvc_time_dependent = mvc_time_dependent
        self.mvc_steepness = mvc_steepness
        self.modality = modality
        self.consistency_weight = consistency_weight
        self.consistency_source = consistency_source

    def __call__(self, output, label, mask, epoch=1, max_epoch=70,
                 spixel=None, raw_image=None):
        mods = self.modality
        fused = fused_bundled_reductions(
            [output[m]["out_vol"] for m in mods], label, mask)

        total_loss = 0.0
        loss_dict = {}

        # --- per-modality single losses -----------------------------------
        for i, modality in enumerate(mods):
            mse = fused["single_mse"][i]
            single = {"total_loss": mse, "mse_loss": mse}
            for k, v in single.items():
                loss_dict[f"{k}/{modality}"] = v
            total_loss = total_loss + single["total_loss"]

        # --- multi-view-consistency weight --------------------------------
        if self.mvc_time_dependent:
            mvc_weight = self.mvc_weight * math.exp(
                -self.mvc_steepness * (1 - epoch / max_epoch) ** 2)
        else:
            mvc_weight = self.mvc_weight

        # --- multi-view consistency loss (tgt_map never leaves VMEM) ------
        mvc_total = fused["mvc_mse"].mean()
        loss_dict["mvc_loss"] = mvc_total

        # --- ensemble consistency terms ------------------------------------
        if self.consistency_weight != 0.0 and self.consistency_source == "ensemble":
            for i, modality in enumerate(mods):
                cons = fused["cons_mse"][i]
                loss_dict[f"consistency_loss/{modality}"] = cons
                total_loss = total_loss + (
                    self.consistency_weight
                    * cons
                    * math.exp(-self.mvc_steepness * (1 - epoch / max_epoch) ** 2))

        total_loss = total_loss + mvc_weight * mvc_total
        return {"total_loss": total_loss, **loss_dict}


# ----------------------------------------------------------------------------
# Pure-jnp reference (silent correctness check).
# ----------------------------------------------------------------------------
def _reference_total_loss(output, label, mask, mods, mvc_weight, mvc_time_dependent,
                          mvc_steepness, consistency_weight, consistency_source,
                          epoch, max_epoch):
    lab = label.astype(jnp.float32)
    maskb = jnp.broadcast_to(mask, lab.shape).astype(jnp.float32)
    cnt = jnp.maximum(maskb.sum(), 1.0)
    vols = [output[m]["out_vol"].astype(jnp.float32) for m in mods]

    total = 0.0
    for v in vols:
        total = total + (((v - lab) ** 2) * maskb).sum() / cnt

    if mvc_time_dependent:
        w = mvc_weight * math.exp(-mvc_steepness * (1 - epoch / max_epoch) ** 2)
    else:
        w = mvc_weight

    tgt = sum(vols) / len(vols)
    mvc = sum((((v - tgt) ** 2) * maskb).sum() / cnt for v in vols) / len(vols)

    if consistency_weight != 0.0 and consistency_source == "ensemble":
        for v in vols:
            cons = ((v - tgt) ** 2).mean()
            total = total + consistency_weight * cons * math.exp(
                -mvc_steepness * (1 - epoch / max_epoch) ** 2)

    return total + w * mvc


if __name__ == "__main__":
    key = jax.random.PRNGKey(0)
    B, C, H, W = 2, 4, 16, 16                      # NCHW, H*W = 256 (2 lane tiles)
    k1, k2, k3, k4 = jax.random.split(key, 4)

    # Volumes / label streamed in their native bf16 (half the HBM bytes); the
    # kernel casts to f32 in-register.  Mask stays at (B, 1, H, W) and is never
    # materialized at C channels.
    output = {
        "rgb":   {"out_vol": jax.random.normal(k1, (B, C, H, W), jnp.float32)
                  .astype(jnp.bfloat16)},
        "depth": {"out_vol": jax.random.normal(k2, (B, C, H, W), jnp.float32)
                  .astype(jnp.bfloat16)},
    }
    label = jax.random.normal(k3, (B, C, H, W), jnp.float32).astype(jnp.bfloat16)
    mask = (jax.random.uniform(k4, (B, 1, H, W)) > 0.3).astype(jnp.float32)

    loss_fn = BundledLoss(
        multi_view_consistency_weight=0.5,
        mvc_time_dependent=True,
        mvc_steepness=5.0,
        modality=["rgb", "depth"],
        consistency_weight=0.1,
        consistency_source="ensemble",
    )

    out = loss_fn(output, label, mask, epoch=10, max_epoch=70)
    jax.block_until_ready(out["total_loss"])

    # Silent correctness check against a pure-jnp reference.
    ref_total = _reference_total_loss(
        output, label, mask, ["rgb", "depth"],
        mvc_weight=0.5, mvc_time_dependent=True, mvc_steepness=5.0,
        consistency_weight=0.1, consistency_source="ensemble",
        epoch=10, max_epoch=70)
    assert jnp.allclose(out["total_loss"], ref_total, rtol=1e-4, atol=1e-4), (
        float(out["total_loss"]), float(ref_total))

    print("KERNEL_OK")
</pallas_src>

<mosaic_0001>
module attributes {stable_mosaic.version = 11 : i64} {
  func.func @kernel(%arg0: i32, %arg1: i32, %arg2: i32, %arg3: memref<1x4x256xbf16, #tpu.memory_space<vmem>>, %arg4: memref<1x4x256xbf16, #tpu.memory_space<vmem>>, %arg5: memref<1x4x256xbf16, #tpu.memory_space<vmem>>, %arg6: memref<1x1x256xf32, #tpu.memory_space<vmem>>, %arg7: memref<1x1x7x1xf32, #tpu.memory_space<vmem>>) attributes {dimension_semantics = [#tpu.dimension_semantics<parallel>, #tpu.dimension_semantics<parallel>, #tpu.dimension_semantics<arbitrary>], iteration_bounds = array<i64: 2, 1, 1>, scalar_prefetch = 0 : i64, scratch_operands = 0 : i64, tpu.core_type = #tpu.core_type<tc>, window_params = [{transform_indices = @transform_0, window_bounds = array<i64: 1, 4, 256>}, {transform_indices = @transform_1, window_bounds = array<i64: 1, 4, 256>}, {transform_indices = @transform_2, window_bounds = array<i64: 1, 4, 256>}, {transform_indices = @transform_3, window_bounds = array<i64: 1, 1, 256>}, {transform_indices = @transform_4, window_bounds = array<i64: 1, 1, 7, 1>}]} {
    %c0_i32 = arith.constant 0 : i32
    %0 = arith.cmpi eq, %arg2, %c0_i32 : i32
    %1 = arith.extui %0 : i1 to i32
    %c0_i32_0 = arith.constant 0 : i32
    %2 = arith.cmpi ne, %1, %c0_i32_0 : i32
    scf.if %2 {
      %cst_39 = arith.constant 0.000000e+00 : f32
      %66 = vector.broadcast %cst_39 : f32 to vector<1x1x7x1xf32>
      %c0_40 = arith.constant 0 : index
      %c0_41 = arith.constant 0 : index
      %c0_42 = arith.constant 0 : index
      %c0_43 = arith.constant 0 : index
      %67 = vector.load %arg7[%c0_40, %c0_41, %c0_42, %c0_43] : memref<1x1x7x1xf32, #tpu.memory_space<vmem>>, vector<1x1x7x1xf32>
      tpu.vector_store %arg7[%c0_40, %c0_41, %c0_42, %c0_43], %66 {strides = array<i32>} : memref<1x1x7x1xf32, #tpu.memory_space<vmem>>, vector<1x1x7x1xf32>,
    } else {
    }
    %c0 = arith.constant 0 : index
    %c0_1 = arith.constant 0 : index
    %c0_2 = arith.constant 0 : index
    %3 = vector.load %arg5[%c0, %c0_1, %c0_2] : memref<1x4x256xbf16, #tpu.memory_space<vmem>>, vector<1x4x256xbf16>
    %4 = vector.shape_cast %3 : vector<1x4x256xbf16> to vector<4x256xbf16>
    %5 = arith.extf %4 : vector<4x256xbf16> to vector<4x256xf32>
    %c0_3 = arith.constant 0 : index
    %c0_4 = arith.constant 0 : index
    %c0_5 = arith.constant 0 : index
    %6 = vector.load %arg6[%c0_3, %c0_4, %c0_5] : memref<1x1x256xf32, #tpu.memory_space<vmem>>, vector<1x1x256xf32>
    %7 = vector.shape_cast %6 : vector<1x1x256xf32> to vector<1x256xf32>
    %c0_6 = arith.constant 0 : index
    %c0_7 = arith.constant 0 : index
    %c0_8 = arith.constant 0 : index
    %8 = vector.load %arg3[%c0_6, %c0_7, %c0_8] : memref<1x4x256xbf16, #tpu.memory_space<vmem>>, vector<1x4x256xbf16>
    %9 = vector.shape_cast %8 : vector<1x4x256xbf16> to vector<4x256xbf16>
    %10 = arith.extf %9 : vector<4x256xbf16> to vector<4x256xf32>
    %c0_9 = arith.constant 0 : index
    %c0_10 = arith.constant 0 : index
    %c0_11 = arith.constant 0 : index
    %11 = vector.load %arg4[%c0_9, %c0_10, %c0_11] : memref<1x4x256xbf16, #tpu.memory_space<vmem>>, vector<1x4x256xbf16>
    %12 = vector.shape_cast %11 : vector<1x4x256xbf16> to vector<4x256xbf16>
    %13 = arith.extf %12 : vector<4x256xbf16> to vector<4x256xf32>
    %14 = arith.addf %10, %13 : vector<4x256xf32>
    %cst = arith.constant 5.000000e-01 : f32
    %15 = vector.broadcast %cst : f32 to vector<4x256xf32>
    %16 = arith.mulf %14, %15 : vector<4x256xf32>
    %c0_12 = arith.constant 0 : index
    %c0_13 = arith.constant 0 : index
    %c0_14 = arith.constant 0 : index
    %17 = vector.load %arg3[%c0_12, %c0_13, %c0_14] : memref<1x4x256xbf16, #tpu.memory_space<vmem>>, vector<1x4x256xbf16>
    %18 = vector.shape_cast %17 : vector<1x4x256xbf16> to vector<4x256xbf16>
    %19 = arith.extf %18 : vector<4x256xbf16> to vector<4x256xf32>
    %20 = arith.subf %19, %5 : vector<4x256xf32>
    %21 = arith.mulf %20, %20 : vector<4x256xf32>
    %cst_15 = arith.constant dense<0.000000e+00> : vector<256xf32>
    %22 = vector.multi_reduction <add>, %21, %cst_15 [0] : vector<4x256xf32> to vector<256xf32>
    %23 = vector.shape_cast %22 : vector<256xf32> to vector<1x256xf32>
    %24 = arith.mulf %23, %7 : vector<1x256xf32>
    %cst_16 = arith.constant dense<0.000000e+00> : vector<1xf32>
    %25 = vector.multi_reduction <add>, %24, %cst_16 [1] : vector<1x256xf32> to vector<1xf32>
    %26 = vector.shape_cast %25 : vector<1xf32> to vector<1x1xf32>
    %27 = arith.subf %19, %16 : vector<4x256xf32>
    %28 = arith.mulf %27, %27 : vector<4x256xf32>
    %cst_17 = arith.constant dense<0.000000e+00> : vector<256xf32>
    %29 = vector.multi_reduction <add>, %28, %cst_17 [0] : vector<4x256xf32> to vector<256xf32>
    %30 = vector.shape_cast %29 : vector<256xf32> to vector<1x256xf32>
    %31 = arith.mulf %30, %7 : vector<1x256xf32>
    %cst_18 = arith.constant dense<0.000000e+00> : vector<1xf32>
    %32 = vector.multi_reduction <add>, %31, %cst_18 [1] : vector<1x256xf32> to vector<1xf32>
    %33 = vector.shape_cast %32 : vector<1xf32> to vector<1x1xf32>
    %cst_19 = arith.constant dense<0.000000e+00> : vector<4xf32>
    %34 = vector.multi_reduction <add>, %28, %cst_19 [1] : vector<4x256xf32> to vector<4xf32>
    %35 = vector.shape_cast %34 : vector<4xf32> to vector<4x1xf32>
    %cst_20 = arith.constant dense<0.000000e+00> : vector<1xf32>
    %36 = vector.multi_reduction <add>, %35, %cst_20 [0] : vector<4x1xf32> to vector<1xf32>
    %37 = vector.shape_cast %36 : vector<1xf32> to vector<1x1xf32>
    %c0_21 = arith.constant 0 : index
    %c0_22 = arith.constant 0 : index
    %c0_23 = arith.constant 0 : index
    %38 = vector.load %arg4[%c0_21, %c0_22, %c0_23] : memref<1x4x256xbf16, #tpu.memory_space<vmem>>, vector<1x4x256xbf16>
    %39 = vector.shape_cast %38 : vector<1x4x256xbf16> to vector<4x256xbf16>
    %40 = arith.extf %39 : vector<4x256xbf16> to vector<4x256xf32>
    %41 = arith.subf %40, %5 : vector<4x256xf32>
    %42 = arith.mulf %41, %41 : vector<4x256xf32>
    %cst_24 = arith.constant dense<0.000000e+00> : vector<256xf32>
    %43 = vector.multi_reduction <add>, %42, %cst_24 [0] : vector<4x256xf32> to vector<256xf32>
    %44 = vector.shape_cast %43 : vector<256xf32> to vector<1x256xf32>
    %45 = arith.mulf %44, %7 : vector<1x256xf32>
    %cst_25 = arith.constant dense<0.000000e+00> : vector<1xf32>
    %46 = vector.multi_reduction <add>, %45, %cst_25 [1] : vector<1x256xf32> to vector<1xf32>
    %47 = vector.shape_cast %46 : vector<1xf32> to vector<1x1xf32>
    %48 = arith.subf %40, %16 : vector<4x256xf32>
    %49 = arith.mulf %48, %48 : vector<4x256xf32>
    %cst_26 = arith.constant dense<0.000000e+00> : vector<256xf32>
    %50 = vector.multi_reduction <add>, %49, %cst_26 [0] : vector<4x256xf32> to vector<256xf32>
    %51 = vector.shape_cast %50 : vector<256xf32> to vector<1x256xf32>
    %52 = arith.mulf %51, %7 : vector<1x256xf32>
    %cst_27 = arith.constant dense<0.000000e+00> : vector<1xf32>
    %53 = vector.multi_reduction <add>, %52, %cst_27 [1] : vector<1x256xf32> to vector<1xf32>
    %54 = vector.shape_cast %53 : vector<1xf32> to vector<1x1xf32>
    %cst_28 = arith.constant dense<0.000000e+00> : vector<4xf32>
    %55 = vector.multi_reduction <add>, %49, %cst_28 [1] : vector<4x256xf32> to vector<4xf32>
    %56 = vector.shape_cast %55 : vector<4xf32> to vector<4x1xf32>
    %cst_29 = arith.constant dense<0.000000e+00> : vector<1xf32>
    %57 = vector.multi_reduction <add>, %56, %cst_29 [0] : vector<4x1xf32> to vector<1xf32>
    %58 = vector.shape_cast %57 : vector<1xf32> to vector<1x1xf32>
    %cst_30 = arith.constant dense<0.000000e+00> : vector<1xf32>
    %59 = vector.multi_reduction <add>, %7, %cst_30 [1] : vector<1x256xf32> to vector<1xf32>
    %60 = vector.shape_cast %59 : vector<1xf32> to vector<1x1xf32>
    %61 = tpu.concatenate %26, %47, %33, %54, %37, %58, %60 in 0 : vector<1x1xf32>, vector<1x1xf32>, vector<1x1xf32>, vector<1x1xf32>, vector<1x1xf32>, vector<1x1xf32>, vector<1x1xf32> -> vector<7x1xf32>
    %c0_31 = arith.constant 0 : index
    %c0_32 = arith.constant 0 : index
    %c0_33 = arith.constant 0 : index
    %c0_34 = arith.constant 0 : index
    %62 = vector.load %arg7[%c0_31, %c0_32, %c0_33, %c0_34] : memref<1x1x7x1xf32, #tpu.memory_space<vmem>>, vector<1x1x7x1xf32>
    %63 = vector.shape_cast %61 : vector<7x1xf32> to vector<1x1x7x1xf32>
    %64 = arith.addf %62, %63 : vector<1x1x7x1xf32>
    %c0_35 = arith.constant 0 : index
    %c0_36 = arith.constant 0 : index
    %c0_37 = arith.constant 0 : index
    %c0_38 = arith.constant 0 : index
    %65 = vector.load %arg7[%c0_35, %c0_36, %c0_37, %c0_38] : memref<1x1x7x1xf32, #tpu.memory_space<vmem>>, vector<1x1x7x1xf32>
    tpu.vector_store %arg7[%c0_35, %c0_36, %c0_37, %c0_38], %64 {strides = array<i32>} : memref<1x1x7x1xf32, #tpu.memory_space<vmem>>, vector<1x1x7x1xf32>,
    return
  }
  func.func @transform_0(%arg0: i32, %arg1: i32, %arg2: i32) -> (i32, i32, i32) {
    %c1_i32 = arith.constant 1 : i32
    %0 = arith.muli %arg1, %c1_i32 : i32
    %1 = arith.addi %0, %arg2 : i32
    %c0_i32 = arith.constant 0 : i32
    %c0_i32_0 = arith.constant 0 : i32
    return %arg0, %c0_i32, %1 : i32, i32, i32
  }
  func.func @transform_1(%arg0: i32, %arg1: i32, %arg2: i32) -> (i32, i32, i32) {
    %c1_i32 = arith.constant 1 : i32
    %0 = arith.muli %arg1, %c1_i32 : i32
    %1 = arith.addi %0, %arg2 : i32
    %c0_i32 = arith.constant 0 : i32
    %c0_i32_0 = arith.constant 0 : i32
    return %arg0, %c0_i32, %1 : i32, i32, i32
  }
  func.func @transform_2(%arg0: i32, %arg1: i32, %arg2: i32) -> (i32, i32, i32) {
    %c1_i32 = arith.constant 1 : i32
    %0 = arith.muli %arg1, %c1_i32 : i32
    %1 = arith.addi %0, %arg2 : i32
    %c0_i32 = arith.constant 0 : i32
    %c0_i32_0 = arith.constant 0 : i32
    return %arg0, %c0_i32, %1 : i32, i32, i32
  }
  func.func @transform_3(%arg0: i32, %arg1: i32, %arg2: i32) -> (i32, i32, i32) {
    %c1_i32 = arith.constant 1 : i32
    %0 = arith.muli %arg1, %c1_i32 : i32
    %1 = arith.addi %0, %arg2 : i32
    %c0_i32 = arith.constant 0 : i32
    %c0_i32_0 = arith.constant 0 : i32
    return %arg0, %c0_i32, %1 : i32, i32, i32
  }
  func.func @transform_4(%arg0: i32, %arg1: i32, %arg2: i32) -> (i32, i32, i32, i32) {
    %c0_i32 = arith.constant 0 : i32
    %c0_i32_0 = arith.constant 0 : i32
    %c0_i32_1 = arith.constant 0 : i32
    return %arg0, %arg1, %c0_i32, %c0_i32_0 : i32, i32, i32, i32
  }
}

</mosaic_0001>

<bundles_post_ra>
// kernel: tpu_custom_call.1
= control target key start
LH: loop header
LB: loop body
LE: loop exit
PB: predicated region body
PF: predicated region fallthrough
CT: control target
= control target key end

     0   :  { %9 = vsyncpa [#allocation3], 0  ;;  %s1231_s0 = inlined_call_operand.hbm [shape: bf16[2,4,256], index: 0, kind: input, shape index: {}]   ;;  %s1232_s1 = inlined_call_operand.hbm [shape: bf16[2,4,256], index: 1, kind: input, shape index: {}]   ;;  %s1233_s2 = inlined_call_operand.hbm [shape: bf16[2,4,256], index: 2, kind: input, shape index: {}]   ;;  %s1234_s3 = inlined_call_operand.vmem [shape: f32[2,1,256], index: 3, kind: input, shape index: {}]   ;;  %s1235_s4 = inlined_call_operand.vmem [shape: f32[2,1,7,1], index: 4, kind: output, shape index: {}]  }
   0x1   :  { %11 = vsyncpa [#allocation3 + $0x1], 0 }
   0x2   :  { %12 = vsyncpa [#allocation5], 0 }
   0x3   :  { %14 = vsyncpa [#allocation5 + $0x1], 0  ;;  %s985_s15 = smov 0   ;;  %s987_s16 = smov 0  }
   0x4   :  { %s989_s17 = smov 0   ;;  %s991_s18 = smov 0  }
   0x5   :  { %s993_s19 = smov 0   ;;  %s995_s20 = smov 0  }
   0x6 LB: > { %s1237_s21 = sadd.s32 4294967295, %s954_s20   ;;  %s39_s22 = sadd.s32 1, %s950_s19  ;;  %s954_s20 = sphi %s995_s20, %s20_s20   ;;  %s950_s19 = sphi %s993_s19, %s1254_s19   ;;  %s946_s18 = sphi %s991_s18, %s1253_s18   ;;  %s942_s17 = sphi %s989_s17, %s1252_s17   ;;  %s938_s16 = sphi %s987_s16, %s1251_s16   ;;  %s934_s15 = sphi %s985_s15, %s1250_s15  }
   0x7   : > { %p41_p0 = scmp.ge.s32.totalorder %s39_s22, 2  ;;  %s50_s23 = sadd.s32 1, %s942_s17 }
   0x8   : > { %p57_p1 = scmp.ne.s32.totalorder %s942_s17, %s938_s16  ;;  %p58_p2 = scmp.eq.s32.totalorder %s954_s20, 0 }
   0x9   : > { %s1256_s22 = smov (%p41_p0, %s39_s22), 0  ;;  %p63_p4 = scmp.ne.s32.totalorder %s938_s16, %s934_s15 }
   0xa   : > { %p59_p3 = por %p58_p2, %p57_p1  ;;  %s45_s24 = ssub.s32 %s950_s19, %s1256_s22 }
   0xb   : > { %p64_p5 = scmp.eq.s32.totalorder %s1237_s21, 0  ;;  %p48_p6 = scmp.eq.s32.totalorder %s45_s24, 0 }
   0xc   : > { %p760_p8 = scmp.lt.s32.totalorder %s954_s20, 2  ;;  %s205_s27 = sand.u32 1, %s942_s17  }
   0xd   : > { %p1026_p7 = por %p64_p5, %p63_p4  ;;  %s1036_s28 = sshll.u32 %s950_s19, 6 }
   0xe   : > { %s1032_s26 = scalar_select %p48_p6, %s942_s17, %s50_s23  }
   0xf   : > { %s1240_s25 = scalar_select %p1026_p7, 1, 0 }
  0x10   : > { %s1040_s29 = sshll.u32 %s205_s27, 2  ;;  %p1042_p9 = pnand %p760_p8, %p59_p3 }
  0x11   : > { %s227_s5 = sand.u32 1, %s954_s20   ;;  %s1051_s8 = scalar_lea.hbm %s1232_s1, %s1036_s28 }
  0x12   : > { %s1241_s30 = scalar_select %p1042_p9, 1, 0 }
  0x13   : > { %s231_s9 = scalar_lea.vmem [#allocation4], %s1040_s29  ;;  %s1057_s11 = scalar_lea.sflag [#allocation5], %s227_s5 }
  0x14   : > { %s242_s10 = sshll.u32 %s231_s9, 4  ;;  %s810_s12 = scalar_lea.hbm %s1051_s8, 64  ;;  %s1054_s10 = int_to_ptr.vmem [resolvable:$true] %s242_s10 }
  0x15   : > { %p811_p11 = scmp.ne.s32.totalorder %s1051_s8, %s810_s12  ;;  %p1063_p12 = pneg %p1042_p9 }
  0x16   : > { %s815_s23 = scalar_lea.hbm %s1232_s1, 128  ;;  %p816_p1 = scmp.lt.u32.totalorder %s1051_s8, %s1232_s1 }
  0x17   : > { %p813_p13 = pnand %p1063_p12, %p811_p11  ;;  %p817_p2 = scmp.lt.u32.totalorder %s815_s23, %s810_s12 }
  0x18   : > { %p819_p4 = scmp.lt.u32.totalorder %s810_s12, %s1051_s8 }
  0x19   : > { %p814_p0 = pneg %p813_p13  ;;  %p818_p3 = por %p817_p2, %p816_p1 }
  0x1b   : > { %p820_p5 = por %p819_p4, %p818_p3 }
  0x1d   : > { %p821_p6 = pnand %p820_p5, %p814_p0 }
  0x1f   : > { %824 = shalt.err (!%p821_p6)
}
  0x20   : > { %s825_s5 = scalar_lea.vmem %s1054_s10, 64  ;;  %s956_s7 = smov [#allocation4]  }
  0x21   : > { %p826_p8 = scmp.ne.s32.totalorder %s1054_s10, %s825_s5  ;;  %s830_s9 = sshll.u32 %s956_s7, 4  ;;  %s831_s9 = int_to_ptr.vmem [resolvable:$false] %s830_s9 }
  0x22   : > { %s832_s14 = scalar_lea.vmem %s831_s9, 128  ;;  %p833_p10 = scmp.lt.s32.totalorder %s1054_s10, %s831_s9 }
  0x23   : > { %p828_p11 = pnand %p826_p8, %p1063_p12  ;;  %p834_p7 = scmp.lt.s32.totalorder %s832_s14, %s825_s5 }
  0x25   : > { %p829_p13 = pneg %p828_p11  ;;  %p835_p1 = por %p834_p7, %p833_p10 }
  0x27   : > { %p836_p2 = pnand %p835_p1, %p829_p13 }
  0x29   : > { %839 = shalt.err (!%p836_p2)
}
  0x2a   : > { %756 = dma.hbm_to_vmem [thread:$0]  (!%p1042_p9), %s1051_s8, 64, %s1054_s10, %s1057_s11  }
  0x2b   : > { %p283_p0 = scmp.lt.s32.totalorder %s954_s20, 3  ;;  %p1243_p3 = scmp.ge.s32.totalorder %s954_s20, 1 }
  0x2c   : > { %s1098_s24 = scalar_lea.hbm %s1231_s0, %s1036_s28  ;;  %s209_s6 = scalar_lea.vmem [#allocation2], %s1040_s29 }
  0x2d   : > { %p1090_p4 = pnand %p1243_p3, %p283_p0  ;;  %s220_s5 = sshll.u32 %s209_s6, 4  ;;  %s221_s5 = int_to_ptr.vmem [resolvable:$true] %s220_s5 }
  0x2e   : > { %s206_s8 = scalar_lea.sflag [#allocation3], %s205_s27  ;;  %s840_s10 = scalar_lea.hbm %s1098_s24, 64 }
  0x2f   : > { %s1244_s12 = scalar_select %p1090_p4, 1, 0 }
  0x30   : > { %p841_p7 = scmp.ne.s32.totalorder %s1098_s24, %s840_s10  ;;  %s845_s14 = scalar_lea.hbm %s1231_s0, 128 }
  0x31   : > { %p846_p6 = scmp.lt.u32.totalorder %s1098_s24, %s1231_s0  ;;  %p847_p8 = scmp.lt.u32.totalorder %s845_s14, %s840_s10 }
  0x32   : > { %p843_p10 = pnand %p841_p7, %p1063_p12  ;;  %p849_p13 = scmp.lt.u32.totalorder %s840_s10, %s1098_s24 }
  0x33   : > { %p848_p11 = por %p847_p8, %p846_p6 }
  0x34   : > { %p844_p5 = pneg %p843_p10 }
  0x35   : > { %p850_p1 = por %p849_p13, %p848_p11 }
  0x37   : > { %p851_p2 = pnand %p850_p1, %p844_p5 }
  0x39   : > { %854 = shalt.err (!%p851_p2)
}
  0x3a   : > { %s855_s27 = scalar_lea.vmem %s221_s5, 64  ;;  %s957_s6 = smov [#allocation2]  }
  0x3b   : > { %p856_p0 = scmp.ne.s32.totalorder %s221_s5, %s855_s27  ;;  %s860_s21 = sshll.u32 %s957_s6, 4  ;;  %s861_s21 = int_to_ptr.vmem [resolvable:$false] %s860_s21 }
  0x3c   : > { %s862_s7 = scalar_lea.vmem %s861_s21, 128  ;;  %p863_p10 = scmp.lt.s32.totalorder %s221_s5, %s861_s21 }
  0x3d   : > { %p858_p3 = pnand %p856_p0, %p1063_p12  ;;  %p864_p4 = scmp.lt.s32.totalorder %s862_s7, %s855_s27 }
  0x3f   : > { %p859_p7 = pneg %p858_p3  ;;  %p865_p9 = por %p864_p4, %p863_p10 }
  0x41   : > { %p866_p6 = pnand %p865_p9, %p859_p7 }
  0x43   : > { %869 = shalt.err (!%p866_p6)
}
  0x44   : > { %p1245_p8 = scmp.ne.s32.totalorder %s1241_s30, 0  ;;  %s1124_s14 = scalar_lea.hbm %s1233_s2, %s1036_s28 }
  0x45   : > { %s253_s21 = scalar_lea.vmem [#allocation6], %s1040_s29  ;;  %s870_s23 = scalar_lea.hbm %s1124_s14, 64 }
  0x46   : > { %753 = dma.hbm_to_vmem [thread:$0]  (!%p1245_p8), %s1098_s24, 64, %s221_s5, %s206_s8  }
  0x47   : > { %s264_s15 = sshll.u32 %s253_s21, 4  ;;  %p871_p9 = scmp.ne.s32.totalorder %s1124_s14, %s870_s23  ;;  %s265_s15 = int_to_ptr.vmem [resolvable:$true] %s264_s15 }
  0x48   : > { %s875_s24 = scalar_lea.hbm %s1233_s2, 128  ;;  %p876_p11 = scmp.lt.u32.totalorder %s1124_s14, %s1233_s2 }
  0x49   : > { %p873_p4 = pnand %p871_p9, %p1063_p12  ;;  %p877_p13 = scmp.lt.u32.totalorder %s875_s24, %s870_s23 }
  0x4a   : > { %p879_p2 = scmp.lt.u32.totalorder %s870_s23, %s1124_s14 }
  0x4b   : > { %p874_p5 = pneg %p873_p4  ;;  %p878_p1 = por %p877_p13, %p876_p11 }
  0x4d   : > { %p880_p0 = por %p879_p2, %p878_p1 }
  0x4f   : > { %p881_p3 = pnand %p880_p0, %p874_p5 }
  0x51   : > { %884 = shalt.err (!%p881_p3)
}
  0x52   : > { %s885_s28 = scalar_lea.vmem %s265_s15, 64  ;;  %s958_s29 = smov [#allocation6]  }
  0x53   : > { %p886_p7 = scmp.ne.s32.totalorder %s265_s15, %s885_s28  ;;  %s890_s7 = sshll.u32 %s958_s29, 4  ;;  %s891_s7 = int_to_ptr.vmem [resolvable:$false] %s890_s7 }
  0x54   : > { %s892_s10 = scalar_lea.vmem %s891_s7, 128  ;;  %p893_p9 = scmp.lt.s32.totalorder %s265_s15, %s891_s7 }
  0x55   : > { %p888_p10 = pnand %p886_p7, %p1063_p12  ;;  %p894_p4 = scmp.lt.s32.totalorder %s892_s10, %s885_s28 }
  0x57   : > { %p889_p6 = pneg %p888_p10  ;;  %p895_p8 = por %p894_p4, %p893_p9 }
  0x59   : > { %p896_p11 = pnand %p895_p8, %p889_p6 }
  0x5b   : > { %899 = shalt.err (!%p896_p11)
}
  0x5c   : > { %p1246_p13 = scmp.ne.s32.totalorder %s1241_s30, 0  ;;  %p1247_p5 = scmp.ne.s32.totalorder %s1244_s12, 0 }
  0x5d   : > { %s289_s13 = sand.u32 (!%p1247_p5), 1, %s938_s16   ;;  %p1248_p12 = scmp.ne.s32.totalorder (!%p1247_p5), %s1240_s25, 0 }
  0x5e   : > { %759 = dma.hbm_to_vmem [thread:$0]  (!%p1246_p13), %s1124_s14, 64, %s265_s15, %s1057_s11  }
  0x5f   : > { %287 = sbr.rel (%p1247_p5) target bundleno = 296 (0x128), region = 36  ;;  %s734_s9 = sshll.u32 (!%p1247_p5), %s289_s13, 2 }
  0x60   : > { %s290_s21 = scalar_lea.sflag (!%p1247_p5), [#allocation3], %s289_s13  ;;  %s293_s23 = scalar_lea.vmem (!%p1247_p5), [#allocation2], %s734_s9 }
  0x66   : > { %925 = dma.done.wait (%p1248_p12), %s290_s21, 64  }
  0x67   : > { %927 = vsyncadd (%p1248_p12), %s290_s21, 4294967232  ;;  %s1249_s27 = sadd.s32 4294967295, %s954_s20   ;;  %s302_s11 = scalar_lea.vmem [#allocation4], %s734_s9 }
  0x68   : > { %s298_s30 = sand.u32 1, %s1249_s27  }
  0x69   : > { %s299_s6 = scalar_lea.sflag [#allocation5], %s298_s30 }
  0x6a   : > { %929 = dma.done.wait (%p1248_p12), %s299_s6, 128  }
  0x6b   : > { %931 = vsyncadd (%p1248_p12), %s299_s6, 4294967168  ;;  %p365_p8 = scmp.lt.s32.totalorder %s946_s18, 1  ;;  %v417_v0 = vlaneseq  ;;  %v390_v2 = vld [vmem:[%s293_s23] sm:$0xf]  ;;  %v392_v3 = vld [vmem:[%s302_s11] sm:$0xf] }
  0x6c   : > { %s311_s14 = scalar_lea.vmem [#allocation6], %s734_s9  ;;  %v391_v5 = vunpack.c.l.bf16 %v390_v2  ;;  %v393_v6 = vunpack.c.l.bf16 %v392_v3  ;;  %vm401_vm0 = vcmask 1043456   ;;  %vm429_vm1 = vcmask 1040384  }
  0x6d   : > { %s1258_s18 = smov (!%p365_p8, %s946_s18), 1  ;;  %v418_v1 = vshrl.u32 %v417_v0, 7  ;;  %v387_v4 = vld [vmem:[%s311_s14] sm:$0xf]  ;;  %vm385_vm2 = vcmask 6144   ;;  %vm551_vm3 = vcmask 1041408  }
  0x6e   : > { %s737_s12 = sshll.u32 %s1258_s18, 1  ;;  %v388_v7 = vunpack.c.l.bf16 %v387_v4  ;;  %v394_v8 = vadd.f32 %v393_v6, %v391_v5  ;;  %s738_s5 = sshll.u32 %s1258_s18, 3  ;;  %vm553_vm4 = vcmask 1042432   ;;  %vm556_vm5 = vcmask 1044480  }
  0x6f   : > { %s371_s25 = scalar_lea.vmem %s1234_s3, %s737_s12  ;;  %v419_v11 = vsub.s32 0, %v418_v1  ;;  %v423_v16 = vsub.s32 1, %v418_v1  ;;  %s1202_s29 = scalar_lea.vmem %s1235_s4, %s738_s5  ;;  %vm558_vm6 = vcmask 1045504  }
  0x70   : > { %v396_v9 = vsub.f32 %v391_v5, %v388_v7  ;;  %v471_v10 = vsub.f32 %v393_v6, %v388_v7  ;;  %v395_v12 = vmul.f32 0.5, %v394_v8  ;;  %v389_v13 = vld [vmem:[%s371_s25] sm:$0x3] }
  0x71   : > { %v1167_v21 = vrot.slane %v389_v13, %v419_v11  ;;  %v1171_v29 = vrot.slane %v389_v13, %v423_v16 }
  0x72   : > { %v472_v14 = vmul.f32 %v471_v10, %v471_v10  ;;  %v397_v15 = vmul.f32 %v396_v9, %v396_v9  ;;  %v435_v17 = vsub.f32 %v391_v5, %v395_v12  ;;  %v497_v18 = vsub.f32 %v393_v6, %v395_v12 }
  0x74   : > { %v474_v19 = vcombine.high %v472_v14, %v472_v14  ;;  %v476_v20 = vsel %vm401_vm0, %v472_v14, 0.0  ;;  %v399_v23 = vcombine.high %v397_v15, %v397_v15  ;;  %v402_v24 = vsel %vm401_vm0, %v397_v15, 0.0 }
  0x75   : > { %v477_v22 = vrot.slane %v476_v20, 4  ;;  %v436_v25 = vmul.f32 %v435_v17, %v435_v17  ;;  %v498_v26 = vmul.f32 %v497_v18, %v497_v18  ;;  %v403_v28 = vrot.slane %v402_v24, 4 }
  0x76   : > { %v483_v27 = vsel %vm401_vm0, %v474_v19, 0.0  ;;  %v409_v32 = vsel %vm401_vm0, %v399_v23, 0.0 }
  0x77   : > { %v478_v30 = vadd.f32 %v477_v22, %v476_v20  ;;  %v484_v31 = vrot.slane %v483_v27, 4  ;;  %v438_v33 = vcombine.high %v436_v25, %v436_v25  ;;  %v440_v34 = vsel %vm401_vm0, %v436_v25, 0.0 }
  0x78   : > { %v500_v35 = vcombine.high %v498_v26, %v498_v26  ;;  %v502_v36 = vsel %vm401_vm0, %v498_v26, 0.0  ;;  %v441_v37 = vrot.slane %v440_v34, 4  ;;  %v404_v43 = vadd.f32 %v403_v28, %v402_v24 }
  0x79   : > { %v503_v38 = vrot.slane %v502_v36, 4  ;;  %v479_v39 = vrot.slane %v478_v30, 2  ;;  %v485_v40 = vadd.f32 %v484_v31, %v483_v27  ;;  %v447_v41 = vsel %vm401_vm0, %v438_v33, 0.0 }
  0x7a   : > { %v509_v42 = vsel %vm401_vm0, %v500_v35, 0.0  ;;  %v410_v44 = vrot.slane %v409_v32, 4  ;;  %v442_v45 = vadd.f32 %v441_v37, %v440_v34  ;;  %v461_v46 = vadd.f32 %v447_v41, %v440_v34 }
  0x7b   : > { %v448_v47 = vrot.slane %v447_v41, 4  ;;  %v504_v48 = vadd.f32 %v503_v38, %v502_v36  ;;  %v510_v49 = vrot.slane %v509_v42, 4  ;;  %v523_v50 = vadd.f32 %v509_v42, %v502_v36 }
  0x7c   : > { %v480_v51 = vadd.f32 %v479_v39, %v478_v30  ;;  %v486_v52 = vrot.slane %v485_v40, 2  ;;  %v443_v53 = vrot.slane %v442_v45, 2  ;;  %462 = vadd.xlane.f32.xlu0 %v461_v46  ;;  %v405_v56 = vrot.slane %v404_v43, 2 }
  0x7d   : > { %v449_v54 = vadd.f32 %v448_v47, %v447_v41  ;;  %v505_v55 = vrot.slane %v504_v48, 2  ;;  %v511_v57 = vadd.f32 %v510_v49, %v509_v42  ;;  %v411_v60 = vadd.f32 %v410_v44, %v409_v32 }
  0x7e   : > { %v481_v58 = vrot.slane %v480_v51, 1  ;;  %v487_v59 = vadd.f32 %v486_v52, %v485_v40  ;;  %v444_v61 = vadd.f32 %v443_v53, %v442_v45  ;;  %v406_v0 = vadd.f32 %v405_v56, %v404_v43 }
  0x7f   : > { %v450_v62 = vrot.slane %v449_v54, 2  ;;  %v506_v63 = vadd.f32 %v505_v55, %v504_v48  ;;  %v512_v1 = vrot.slane %v511_v57, 2  ;;  %v412_v4 = vrot.slane %v411_v60, 2 }
  0x80   : > { %v482_v2 = vadd.f32 %v481_v58, %v480_v51  ;;  %v488_v3 = vrot.slane %v487_v59, 1  ;;  %524 = vadd.xlane.f32.xlu0 %v523_v50  ;;  %v407_v6 = vrot.slane %v406_v0, 1  ;;  %v445_v7 = vrot.slane %v444_v61, 1 }
  0x81   : > { %v451_v5 = vadd.f32 %v450_v62, %v449_v54  ;;  %v507_v8 = vrot.slane %v506_v63, 1  ;;  %v513_v9 = vadd.f32 %v512_v1, %v511_v57  ;;  %v413_v12 = vadd.f32 %v412_v4, %v411_v60 }
  0x82   : > { %v489_v10 = vadd.f32 %v488_v3, %v487_v59  ;;  %v490_v11 = vmul.f32 %v482_v2, %v1167_v21  ;;  %v408_v13 = vadd.f32 %v407_v6, %v406_v0  ;;  %v446_v14 = vadd.f32 %v445_v7, %v444_v61 }
  0x83   : > { %v452_v15 = vrot.slane %v451_v5, 1  ;;  %v508_v16 = vadd.f32 %v507_v8, %v506_v63  ;;  %v414_v19 = vrot.slane %v413_v12, 1  ;;  %v514_v20 = vrot.slane %v513_v9, 1 }
  0x84   : > { %v491_v17 = vmul.f32 %v489_v10, %v1171_v29  ;;  %v492_v18 = vsel %vm429_vm1, %v490_v11, 0.0  ;;  %v427_v22 = vmul.f32 %v1167_v21, %v408_v13  ;;  %v454_v24 = vmul.f32 %v446_v14, %v1167_v21 }
  0x85   : > { %v453_v23 = vadd.f32 %v452_v15, %v451_v5  ;;  %v415_v26 = vadd.f32 %v414_v19, %v413_v12  ;;  %v515_v27 = vadd.f32 %v514_v20, %v513_v9  ;;  %v516_v28 = vmul.f32 %v508_v16, %v1167_v21 }
  0x86   : > { %v493_v25 = vsel %vm429_vm1, %v491_v17, 0.0  ;;  %v456_v32 = vsel %vm429_vm1, %v454_v24, 0.0  ;;  %v430_v34 = vsel %vm429_vm1, %v427_v22, 0.0  ;;  %v533_v37 = vsel %vm429_vm1, %v1167_v21, 0.0 }
  0x87   : > { %v494_v30 = vadd.f32 %v493_v25, %v492_v18  ;;  %v455_v31 = vmul.f32 %v453_v23, %v1171_v29  ;;  %v428_v33 = vmul.f32 %v1171_v29, %v415_v26  ;;  %v517_v35 = vmul.f32 %v515_v27, %v1171_v29 }
  0x88   : > { %v534_v38 = vsel %vm429_vm1, %v1171_v29, 0.0  ;;  %v518_v41 = vsel %vm429_vm1, %v516_v28, 0.0  ;;  %v959_v21 = vmov 0.0  }
  0x89   : > { %495 = vadd.xlane.f32.xlu1 %v494_v30  ;;  %v457_v36 = vsel %vm429_vm1, %v455_v31, 0.0  ;;  %v431_v39 = vsel %vm429_vm1, %v428_v33, 0.0  ;;  %v519_v42 = vsel %vm429_vm1, %v517_v35, 0.0  ;;  %v535_v45 = vadd.f32 %v534_v38, %v533_v37  ;;  %386 = vst.msk [vmem:[%s1202_s29] sm:$0x7f] %vm385_vm2, %v959_v21 }
  0x8a   : > { %v458_v40 = vadd.f32 %v457_v36, %v456_v32  ;;  %v432_v43 = vadd.f32 %v431_v39, %v430_v34  ;;  %v520_v44 = vadd.f32 %v519_v42, %v518_v41 }
  0x8c   : > { %433 = vadd.xlane.f32.xlu0 %v432_v43 }
  0x8d   : > { %459 = vadd.xlane.f32.xlu1 %v458_v40 }
  0x90   : > { %536 = vadd.xlane.f32.xlu0 %v535_v45  ;;  %v560_v10 = vld [vmem:[%s1202_s29] sm:$0x7f] }
  0x91   : > { %521 = vadd.xlane.f32.xlu1 %v520_v44 }
 0x109   : > { %v463_v29 = vpop.xlane.xlu0 %462 }
 0x10a   : > { %v464_v46 = vsel %vm401_vm0, %v463_v29, 0.0 }
 0x10b   : > { %v465_v47 = vrot.slane %v464_v46, 4 }
 0x10d   : > { %v525_v48 = vpop.xlane.xlu0 %524  ;;  %v466_v50 = vadd.f32 %v465_v47, %v464_v46 }
 0x10e   : > { %v526_v49 = vsel %vm401_vm0, %v525_v48, 0.0 }
 0x10f   : > { %v527_v51 = vrot.slane %v526_v49, 4  ;;  %v467_v53 = vrot.slane %v466_v50, 2 }
 0x111   : > { %v528_v52 = vadd.f32 %v527_v51, %v526_v49  ;;  %v468_v56 = vadd.f32 %v467_v53, %v466_v50 }
 0x113   : > { %v529_v54 = vrot.slane %v528_v52, 2  ;;  %v469_v61 = vrot.slane %v468_v56, 1 }
 0x115   : > { %v530_v57 = vadd.f32 %v529_v54, %v528_v52  ;;  %v470_v4 = vadd.f32 %v469_v61, %v468_v56 }
 0x116   : > { %v496_v55 = vpop.xlane.xlu1 %495 }
 0x117   : > { %v539_v60 = vrot.slane %v496_v55, 7  ;;  %v531_v63 = vrot.slane %v530_v57, 1 }
 0x119   : > { %v434_v58 = vpop.xlane.xlu0 %433  ;;  %v532_v7 = vadd.f32 %v531_v63, %v530_v57 }
 0x11a   : > { %v460_v59 = vpop.xlane.xlu1 %459  ;;  %v550_v2 = vsel %vm429_vm1, %v434_v58, %v539_v60 }
 0x11b   : > { %v542_v62 = vrot.slane %v460_v59, 6 }
 0x11d   : > { %v537_v1 = vpop.xlane.xlu0 %536  ;;  %v552_v5 = vsel %vm551_vm3, %v550_v2, %v542_v62 }
 0x11e   : > { %v522_v0 = vpop.xlane.xlu1 %521  ;;  %v548_v6 = vrot.slane %v537_v1, 2 }
 0x11f   : > { %v545_v3 = vrot.slane %v522_v0, 5 }
 0x121   : > { %v554_v8 = vsel %vm553_vm4, %v552_v5, %v545_v3 }
 0x122   : > { %v555_v9 = vsel %vm401_vm0, %v554_v8, %v470_v4 }
 0x123   : > { %v557_v11 = vsel %vm556_vm5, %v555_v9, %v532_v7 }
 0x124   : > { %v559_v12 = vsel %vm558_vm6, %v557_v11, %v548_v6 }
 0x125   : > { %v561_v13 = vadd.f32 %v560_v10, %v559_v12 }
 0x127   : > { %563 = vst.msk [vmem:[%s1202_s29] sm:$0x7f] %vm385_vm2, %v561_v13 }
 0x128 PF: > { %s20_s20 = sadd.s32 1, %s954_s20   ;;  %s1250_s15 = smov %s938_s16 }
 0x129   : > { %p17_p1 = scmp.ge.s32.totalorder %s20_s20, 4   ;;  %s1251_s16 = smov %s942_s17 }
 0x12a   : > { %s1252_s17 = smov %s1032_s26  ;;  %s1253_s18 = smov %s950_s19 }
 0x12b   : > { %s1254_s19 = smov %s1256_s22  ;;  %19 = sbr.rel (!%p17_p1) target bundleno = 6 (0x6), region = 107 }
 0x132   :  { %589 = vsyncpa [#allocation3], 1 }
 0x133   :  { %591 = vsyncpa [#allocation3 + $0x1], 1 }
 0x134   :  { %592 = vsyncpa [#allocation5], 1 }
 0x135   :  { %594 = vsyncpa [#allocation5 + $0x1], 1 }

</bundles_post_ra>
